<compile_context>
chip_gen: v7x
topology: tpu7x:2x2x1
jax: 0.10.0
libtpu: 0.0.40
codegen_flags: <defaults>
</compile_context>

<pallas_src>
import functools

import jax
import jax.numpy as jnp
from jax.experimental import pallas as pl
from jax.experimental.pallas import tpu as pltpu


def _critic_kernel(s_ref, a_ref, w1s_ref, w1a_ref, b1_ref, w2_ref, b2_ref,
                   wq_ref, bq_ref, out_ref):
    # fc1 on split weights (no concatenated input) + relu
    h1 = jnp.dot(s_ref[...], w1s_ref[...], preferred_element_type=jnp.float32)
    h1 += jnp.dot(a_ref[...], w1a_ref[...], preferred_element_type=jnp.float32)
    h1 = jnp.maximum(h1 + b1_ref[...], 0.0)
    # fc2 + relu
    h2 = jnp.dot(h1, w2_ref[...], preferred_element_type=jnp.float32)
    h2 = jnp.maximum(h2 + b2_ref[...], 0.0)
    # fc_q (out_features == 1): VPU multiply + XLU lane-reduce, skip the MXU.
    q = jnp.sum(h2 * wq_ref[...], axis=-1, keepdims=True) + bq_ref[...]
    out_ref[...] = q.astype(out_ref.dtype)
    # TODO(synk): for very large batches a lane-dense (1, TB) output layout
    # would avoid masked 1-lane stores; kept (TB, 1) for robust lowering.


def _resident(arr):
    """Full-array BlockSpec with constant index_map -> stays in VMEM across grid."""
    nd = arr.ndim
    return pl.BlockSpec(arr.shape, lambda i, _nd=nd: (0,) * _nd)


@jax.jit
def critic_forward(state, action, params):
    """state: [B, S], action: [B, A]  ->  q: [B, 1]"""
    w1s, w1a, b1 = params["w1s"], params["w1a"], params["b1"]
    w2, b2 = params["w2"], params["b2"]
    wq, bq = params["wq"], params["bq"]

    B, S = state.shape
    A = action.shape[1]
    F1 = w1s.shape[1]
    F2 = w2.shape[1]

    # Batch tile: multiple of 8 sublanes, capped at 512 rows.
    TB = min(512, ((B + 7) // 8) * 8)
    G = pl.cdiv(B, TB)
    Bp = G * TB
    if Bp != B:
        pad = Bp - B
        state = jnp.pad(state, ((0, pad), (0, 0)))
        action = jnp.pad(action, ((0, pad), (0, 0)))

    flops = 2 * Bp * (S * F1 + A * F1 + F1 * F2 + F2)
    bytes_accessed = 4 * (Bp * S + Bp * A + (S + A) * F1 + F1
                          + F1 * F2 + F2 + F2 + 1 + Bp)
    cost = pl.CostEstimate(flops=flops, transcendentals=0,
                           bytes_accessed=bytes_accessed)

    out = pl.pallas_call(
        _critic_kernel,
        out_shape=jax.ShapeDtypeStruct((Bp, 1), jnp.float32),
        grid=(G,),
        in_specs=[
            pl.BlockSpec((TB, S), lambda i: (i, 0)),   # state tile
            pl.BlockSpec((TB, A), lambda i: (i, 0)),   # action tile
            _resident(w1s), _resident(w1a), _resident(b1),
            _resident(w2), _resident(b2),
            _resident(wq), _resident(bq),
        ],
        out_specs=pl.BlockSpec((TB, 1), lambda i: (i, 0)),
        compiler_params=pltpu.CompilerParams(
            dimension_semantics=("parallel",)),
        cost_estimate=cost,
    )(state, action, w1s, w1a, b1, w2, b2, wq, bq)

    return out[:B]


def init_critic_params(key, state_dim, action_dim, fc1_size, fc2_size):
    """Init mimicking nn.Linear default: U(-1/sqrt(fan_in), 1/sqrt(fan_in)).

    fc1's weight is split at init time into w1s [S, fc1] and w1a [A, fc1] so the
    kernel never needs the concatenated input. All weights are [in, out]
    (transposed vs. PyTorch's [out, in]); biases are 2-D [1, out]; fc_q's weight
    is stored as a [1, fc2] row for the VPU reduce.
    """
    def linear(key, fan_in, fan_out):
        kw, kb = jax.random.split(key)
        bound = 1.0 / jnp.sqrt(jnp.float32(fan_in))
        w = jax.random.uniform(kw, (fan_in, fan_out), jnp.float32, -bound, bound)
        b = jax.random.uniform(kb, (1, fan_out), jnp.float32, -bound, bound)
        return w, b

    k1, k2, k3 = jax.random.split(key, 3)
    in_dim = state_dim + action_dim
    w1, b1 = linear(k1, in_dim, fc1_size)
    w2, b2 = linear(k2, fc1_size, fc2_size)
    wq, bq = linear(k3, fc2_size, 1)
    return {
        "w1s": w1[:state_dim],          # [S, fc1]
        "w1a": w1[state_dim:],          # [A, fc1]
        "b1": b1,                       # [1, fc1]
        "w2": w2, "b2": b2,             # [fc1, fc2], [1, fc2]
        "wq": wq.T,                     # [1, fc2]  (row vector for VPU path)
        "bq": bq,                       # [1, 1]
    }


def critic_reference(state, action, params):
    """Pure-JAX reference of the PyTorch forward for correctness check."""
    w1 = jnp.concatenate([params["w1s"], params["w1a"]], axis=0)
    x = jnp.concatenate([state, action], axis=1)
    h1 = jnp.maximum(x @ w1 + params["b1"], 0.0)
    h2 = jnp.maximum(h1 @ params["w2"] + params["b2"], 0.0)
    return h2 @ params["wq"].T + params["bq"]


if __name__ == "__main__":
    # Small shapes consistent with the module: state_dims=(8,), action_dims=(4,)
    batch, state_dim, action_dim = 8, 8, 4
    fc1_size, fc2_size = 32, 32

    key = jax.random.PRNGKey(0)
    kp, ks, ka = jax.random.split(key, 3)

    params = init_critic_params(kp, state_dim, action_dim, fc1_size, fc2_size)
    state = jax.random.normal(ks, (batch, state_dim), jnp.float32)
    action = jax.random.normal(ka, (batch, action_dim), jnp.float32)

    q = critic_forward(state, action, params)
    q = jax.block_until_ready(q)

    q_ref = critic_reference(state, action, params)
    assert q.shape == (batch, 1), q.shape
    assert jnp.allclose(q, q_ref, atol=1e-5, rtol=1e-5), (q, q_ref)

    print("KERNEL_OK")
</pallas_src>

<mosaic_0001>
module attributes {stable_mosaic.version = 11 : i64} {
  func.func @_critic_kernel(%arg0: i32, %arg1: memref<8x8xf32, #tpu.memory_space<vmem>>, %arg2: memref<8x4xf32, #tpu.memory_space<vmem>>, %arg3: memref<8x32xf32, #tpu.memory_space<vmem>>, %arg4: memref<4x32xf32, #tpu.memory_space<vmem>>, %arg5: memref<1x32xf32, #tpu.memory_space<vmem>>, %arg6: memref<32x32xf32, #tpu.memory_space<vmem>>, %arg7: memref<1x32xf32, #tpu.memory_space<vmem>>, %arg8: memref<1x32xf32, #tpu.memory_space<vmem>>, %arg9: memref<1x1xf32, #tpu.memory_space<vmem>>, %arg10: memref<8x1xf32, #tpu.memory_space<vmem>>) attributes {dimension_semantics = [#tpu.dimension_semantics<parallel>], iteration_bounds = array<i64: 1>, scalar_prefetch = 0 : i64, scratch_operands = 0 : i64, tpu.core_type = #tpu.core_type<tc>, window_params = [{transform_indices = @transform_0, window_bounds = array<i64: 8, 8>}, {transform_indices = @transform_1, window_bounds = array<i64: 8, 4>}, {pipeline_mode = #tpu.pipeline_mode<synchronous>, transform_indices = @transform_2, window_bounds = array<i64: 8, 32>}, {pipeline_mode = #tpu.pipeline_mode<synchronous>, transform_indices = @transform_3, window_bounds = array<i64: 4, 32>}, {pipeline_mode = #tpu.pipeline_mode<synchronous>, transform_indices = @transform_4, window_bounds = array<i64: 1, 32>}, {pipeline_mode = #tpu.pipeline_mode<synchronous>, transform_indices = @transform_5, window_bounds = array<i64: 32, 32>}, {pipeline_mode = #tpu.pipeline_mode<synchronous>, transform_indices = @transform_6, window_bounds = array<i64: 1, 32>}, {pipeline_mode = #tpu.pipeline_mode<synchronous>, transform_indices = @transform_7, window_bounds = array<i64: 1, 32>}, {pipeline_mode = #tpu.pipeline_mode<synchronous>, transform_indices = @transform_8, window_bounds = array<i64: 1, 1>}, {transform_indices = @transform_9, window_bounds = array<i64: 8, 1>}]} {
    %c0 = arith.constant 0 : index
    %c0_0 = arith.constant 0 : index
    %0 = vector.load %arg1[%c0, %c0_0] : memref<8x8xf32, #tpu.memory_space<vmem>>, vector<8x8xf32>
    %c0_1 = arith.constant 0 : index
    %c0_2 = arith.constant 0 : index
    %1 = vector.load %arg3[%c0_1, %c0_2] : memref<8x32xf32, #tpu.memory_space<vmem>>, vector<8x32xf32>
    %cst = arith.constant dense<0.000000e+00> : vector<8x32xf32>
    %2 = tpu.matmul %0, %1, %cst {dimension_numbers = #tpu.dot_dimension_numbers<[1], [0], [0], [1], [0, 0, 1, 1], [], []>} : vector<8x8xf32>, vector<8x32xf32>, vector<8x32xf32> -> vector<8x32xf32>
    %c0_3 = arith.constant 0 : index
    %c0_4 = arith.constant 0 : index
    %3 = vector.load %arg2[%c0_3, %c0_4] : memref<8x4xf32, #tpu.memory_space<vmem>>, vector<8x4xf32>
    %c0_5 = arith.constant 0 : index
    %c0_6 = arith.constant 0 : index
    %4 = vector.load %arg4[%c0_5, %c0_6] : memref<4x32xf32, #tpu.memory_space<vmem>>, vector<4x32xf32>
    %cst_7 = arith.constant dense<0.000000e+00> : vector<8x32xf32>
    %5 = tpu.matmul %3, %4, %cst_7 {dimension_numbers = #tpu.dot_dimension_numbers<[1], [0], [0], [1], [0, 0, 1, 1], [], []>} : vector<8x4xf32>, vector<4x32xf32>, vector<8x32xf32> -> vector<8x32xf32>
    %6 = arith.addf %2, %5 : vector<8x32xf32>
    %c0_8 = arith.constant 0 : index
    %c0_9 = arith.constant 0 : index
    %7 = vector.load %arg5[%c0_8, %c0_9] : memref<1x32xf32, #tpu.memory_space<vmem>>, vector<1x32xf32>
    %8 = vector.broadcast %7 : vector<1x32xf32> to vector<8x32xf32>
    %9 = arith.addf %6, %8 : vector<8x32xf32>
    %cst_10 = arith.constant 0.000000e+00 : f32
    %10 = vector.broadcast %cst_10 : f32 to vector<8x32xf32>
    %11 = arith.maximumf %9, %10 : vector<8x32xf32>
    %c0_11 = arith.constant 0 : index
    %c0_12 = arith.constant 0 : index
    %12 = vector.load %arg6[%c0_11, %c0_12] : memref<32x32xf32, #tpu.memory_space<vmem>>, vector<32x32xf32>
    %cst_13 = arith.constant dense<0.000000e+00> : vector<8x32xf32>
    %13 = tpu.matmul %11, %12, %cst_13 {dimension_numbers = #tpu.dot_dimension_numbers<[1], [0], [0], [1], [0, 0, 1, 1], [], []>} : vector<8x32xf32>, vector<32x32xf32>, vector<8x32xf32> -> vector<8x32xf32>
    %c0_14 = arith.constant 0 : index
    %c0_15 = arith.constant 0 : index
    %14 = vector.load %arg7[%c0_14, %c0_15] : memref<1x32xf32, #tpu.memory_space<vmem>>, vector<1x32xf32>
    %15 = vector.broadcast %14 : vector<1x32xf32> to vector<8x32xf32>
    %16 = arith.addf %13, %15 : vector<8x32xf32>
    %cst_16 = arith.constant 0.000000e+00 : f32
    %17 = vector.broadcast %cst_16 : f32 to vector<8x32xf32>
    %18 = arith.maximumf %16, %17 : vector<8x32xf32>
    %c0_17 = arith.constant 0 : index
    %c0_18 = arith.constant 0 : index
    %19 = vector.load %arg8[%c0_17, %c0_18] : memref<1x32xf32, #tpu.memory_space<vmem>>, vector<1x32xf32>
    %20 = vector.broadcast %19 : vector<1x32xf32> to vector<8x32xf32>
    %21 = arith.mulf %18, %20 : vector<8x32xf32>
    %cst_19 = arith.constant dense<0.000000e+00> : vector<8xf32>
    %22 = vector.multi_reduction <add>, %21, %cst_19 [1] : vector<8x32xf32> to vector<8xf32>
    %23 = vector.shape_cast %22 : vector<8xf32> to vector<8x1xf32>
    %c0_20 = arith.constant 0 : index
    %c0_21 = arith.constant 0 : index
    %24 = vector.load %arg9[%c0_20, %c0_21] : memref<1x1xf32, #tpu.memory_space<vmem>>, vector<1x1xf32>
    %25 = vector.broadcast %24 : vector<1x1xf32> to vector<8x1xf32>
    %26 = arith.addf %23, %25 : vector<8x1xf32>
    %c0_22 = arith.constant 0 : index
    %c0_23 = arith.constant 0 : index
    %27 = vector.load %arg10[%c0_22, %c0_23] : memref<8x1xf32, #tpu.memory_space<vmem>>, vector<8x1xf32>
    tpu.vector_store %arg10[%c0_22, %c0_23], %26 {strides = array<i32>} : memref<8x1xf32, #tpu.memory_space<vmem>>, vector<8x1xf32>,
    return
  }
  func.func @transform_0(%arg0: i32) -> (i32, i32) {
    %c0_i32 = arith.constant 0 : i32
    %c0_i32_0 = arith.constant 0 : i32
    return %arg0, %c0_i32 : i32, i32
  }
  func.func @transform_1(%arg0: i32) -> (i32, i32) {
    %c0_i32 = arith.constant 0 : i32
    %c0_i32_0 = arith.constant 0 : i32
    return %arg0, %c0_i32 : i32, i32
  }
  func.func @transform_2(%arg0: i32) -> (i32, i32) {
    %c0_i32 = arith.constant 0 : i32
    %c0_i32_0 = arith.constant 0 : i32
    %c0_i32_1 = arith.constant 0 : i32
    return %c0_i32, %c0_i32_0 : i32, i32
  }
  func.func @transform_3(%arg0: i32) -> (i32, i32) {
    %c0_i32 = arith.constant 0 : i32
    %c0_i32_0 = arith.constant 0 : i32
    %c0_i32_1 = arith.constant 0 : i32
    return %c0_i32, %c0_i32_0 : i32, i32
  }
  func.func @transform_4(%arg0: i32) -> (i32, i32) {
    %c0_i32 = arith.constant 0 : i32
    %c0_i32_0 = arith.constant 0 : i32
    %c0_i32_1 = arith.constant 0 : i32
    return %c0_i32, %c0_i32_0 : i32, i32
  }
  func.func @transform_5(%arg0: i32) -> (i32, i32) {
    %c0_i32 = arith.constant 0 : i32
    %c0_i32_0 = arith.constant 0 : i32
    %c0_i32_1 = arith.constant 0 : i32
    return %c0_i32, %c0_i32_0 : i32, i32
  }
  func.func @transform_6(%arg0: i32) -> (i32, i32) {
    %c0_i32 = arith.constant 0 : i32
    %c0_i32_0 = arith.constant 0 : i32
    %c0_i32_1 = arith.constant 0 : i32
    return %c0_i32, %c0_i32_0 : i32, i32
  }
  func.func @transform_7(%arg0: i32) -> (i32, i32) {
    %c0_i32 = arith.constant 0 : i32
    %c0_i32_0 = arith.constant 0 : i32
    %c0_i32_1 = arith.constant 0 : i32
    return %c0_i32, %c0_i32_0 : i32, i32
  }
  func.func @transform_8(%arg0: i32) -> (i32, i32) {
    %c0_i32 = arith.constant 0 : i32
    %c0_i32_0 = arith.constant 0 : i32
    %c0_i32_1 = arith.constant 0 : i32
    return %c0_i32, %c0_i32_0 : i32, i32
  }
  func.func @transform_9(%arg0: i32) -> (i32, i32) {
    %c0_i32 = arith.constant 0 : i32
    %c0_i32_0 = arith.constant 0 : i32
    return %arg0, %c0_i32 : i32, i32
  }
}

</mosaic_0001>

<bundles_post_ra>
// kernel: critic_forward.1
= control target key start
LH: loop header
LB: loop body
LE: loop exit
PB: predicated region body
PF: predicated region fallthrough
CT: control target
= control target key end

     0   :  { %s545_s0 = inlined_call_operand.hbm [shape: f32[8,8], index: 0, kind: input, shape index: {}]   ;;  %s546_s1 = inlined_call_operand.vmem [shape: f32[8,4], index: 1, kind: input, shape index: {}]   ;;  %s547_s2 = inlined_call_operand.hbm [shape: f32[8,32], index: 2, kind: input, shape index: {}]   ;;  %s548_s3 = inlined_call_operand.vmem [shape: f32[4,32], index: 3, kind: input, shape index: {}]   ;;  %s549_s4 = inlined_call_operand.vmem [shape: f32[1,32], index: 4, kind: input, shape index: {}]   ;;  %s550_s5 = inlined_call_operand.vmem [shape: f32[32,32], index: 5, kind: input, shape index: {}]   ;;  %s551_s6 = inlined_call_operand.vmem [shape: f32[1,32], index: 6, kind: input, shape index: {}]   ;;  %s552_s7 = inlined_call_operand.vmem [shape: f32[1,32], index: 7, kind: input, shape index: {}]   ;;  %s553_s8 = inlined_call_operand.<no memory space> [shape: f32[1,1], index: 8, kind: input, shape index: {}]   ;;  %s554_s9 = inlined_call_operand.vmem [shape: f32[8,1], index: 9, kind: output, shape index: {}]  }
   0x1   :  { %v14_v0 = vstv %s553_s8 }
   0x2   :  { %15 = vst [vmem:[#allocation2] sm:$0x1] %v14_v0 }
   0x3   :  { %16 = vsyncpa [#allocation4], 0 }
   0x4   :  { %17 = vsyncpa [#allocation6], 0  ;;  %s433_s11 = smov [#allocation3]   ;;  %s434_s13 = smov [#allocation5]  }
   0x5   :  { %s24_s12 = sshll.u32 %s433_s11, 4  ;;  %s36_s14 = sshll.u32 %s434_s13, 4  ;;  %s25_s12 = int_to_ptr.vmem [resolvable:$true] %s24_s12  ;;  %s37_s14 = int_to_ptr.vmem [resolvable:$true] %s36_s14 }
   0x6   :  { %s385_s17 = scalar_lea.hbm %s545_s0, 128 }
   0x7   :  { %p386_p0 = scmp.ne.s32.totalorder %s545_s0, %s385_s17  ;;  %p389_p1 = scmp.lt.u32.totalorder %s385_s17, %s545_s0 }
   0x9   :  { %p391_p2 = pnand %p389_p1, %p386_p0 }
   0xb   :  { %394 = shalt.err (!%p391_p2)
}
   0xc   :  { %s395_s8 = scalar_lea.vmem %s25_s12, 128  ;;  %p400_p4 = scmp.lt.s32.totalorder %s25_s12, %s25_s12 }
   0xd   :  { %p396_p3 = scmp.ne.s32.totalorder %s25_s12, %s395_s8  ;;  %p401_p5 = scmp.lt.s32.totalorder %s395_s8, %s395_s8 }
   0xf   :  { %p402_p6 = por %p401_p5, %p400_p4 }
  0x11   :  { %p403_p7 = pnand %p402_p6, %p396_p3 }
  0x13   :  { %406 = shalt.err (!%p403_p7)
}
  0x14   :  { %27 = dma.hbm_to_vmem [thread:$0]  %s545_s0, 128, %s25_s12, [#allocation4]  }
  0x15   :  { %s407_s26 = scalar_lea.hbm %s547_s2, 128 }
  0x16   :  { %p408_p8 = scmp.ne.s32.totalorder %s547_s2, %s407_s26  ;;  %p411_p9 = scmp.lt.u32.totalorder %s407_s26, %s547_s2 }
  0x18   :  { %p413_p10 = pnand %p411_p9, %p408_p8 }
  0x1a   :  { %416 = shalt.err (!%p413_p10)
}
  0x1b   :  { %s417_s10 = scalar_lea.vmem %s37_s14, 128  ;;  %p422_p12 = scmp.lt.s32.totalorder %s37_s14, %s37_s14 }
  0x1c   :  { %p418_p11 = scmp.ne.s32.totalorder %s37_s14, %s417_s10  ;;  %p423_p13 = scmp.lt.s32.totalorder %s417_s10, %s417_s10 }
  0x1e   :  { %p424_p0 = por %p423_p13, %p422_p12 }
  0x20   :  { %p425_p1 = pnand %p424_p0, %p418_p11 }
  0x22   :  { %428 = shalt.err (!%p425_p1)
}
  0x23   :  { %39 = dma.hbm_to_vmem [thread:$0]  %s547_s2, 128, %s37_s14, [#allocation6]  }
  0x24   :  { %429 = dma.done.wait [#allocation4], 128  }
  0x25   :  { %430 = vsyncadd [#allocation4], 4294967168 }
  0x26   :  { %431 = dma.done.wait [#allocation6], 128  }
  0x27   :  { %432 = vsyncadd [#allocation6], 4294967168  ;;  %v435_v1 = vmov 0.0   ;;  %vm436_vm0 = vmmov 0   ;;  %vm66_vm1 = vcmask 1043456   ;;  %vm62_vm2 = vcmask 31744  }
  0x28   :  { %353 = vmatprep.subr.mxu1 %v435_v1  ;;  %355 = vmatprep.mubr.msk.f32.mxu1 %vm436_vm0, %v435_v1  ;;  %v61_v2 = vld [vmem:[%s548_s3] sm:$0xf]  ;;  %v59_v4 = vld [vmem:[#allocation5] sm:$0xff]  ;;  %vm140_vm3 = vcmask 64512   ;;  %v437_v8 = vmov 0.0|0.0   ;;  %v226_v11 = vld [vmem:[%s550_s5 + $0x18] sm:$0xff] }
  0x29   :  { %371 = vmatprep.mubr.msk.f32.mxu0 %vm436_vm0, %v435_v1  ;;  %v60_v3 = vld [vmem:[%s546_s1] sm:$0xff]  ;;  %354 = vmatpush3.msk.msra.mxu1 %vm66_vm1, %v61_v2  ;;  %v224_v7 = vld [vmem:[%s550_s5 + $0x8] sm:$0xff]  ;;  %v225_v10 = vld [vmem:[%s550_s5 + $0x10] sm:$0xff]  ;;  %vm234_vm4 = vcmask 261120   ;;  %vm328_vm5 = vcmask 7168  }
  0x2a   :  { %356 = vmatmul.mubr.msk.f32.vlgmr.msra.gmra.mrb[0].mxu1 %vm62_vm2, %v60_v3  ;;  %358 = vmatprep.subr.mxu1 %v435_v1  ;;  %v58_v5 = vld [vmem:[#allocation3] sm:$0xff]  ;;  %v378_v12 = vpack.c.bf16 %v226_v11, %v225_v10  ;;  %v339_v16 = vld [vmem:[%s549_s4] ss:$0 sm:$0xff] }
  0x2b   :  { %359 = vmatpush3.msra.mxu1 %v59_v4  ;;  %360 = vmatprep.mubr.msk.f32.mxu1 %vm436_vm0, %v435_v1  ;;  %v223_v6 = vld [vmem:[%s550_s5] sm:$0xff] }
  0x2c   :  { %374 = vmatprep.subr.bf16.mxu0 %v437_v8  ;;  %v375_v9 = vpack.c.bf16 %v224_v7, %v223_v6  ;;  %v340_v21 = vld [vmem:[%s551_s6] ss:$0 sm:$0xff] }
  0x2d   :  { %v342_v25 = vld [vmem:[%s552_s7] ss:$0 sm:$0xff] }
  0x2e   :  { %361 = vmatmul.mubr.msk.f32.vlgmr.msra.gmra.mrb[2].mxu1 %vm140_vm3, %v58_v5  ;;  %376 = vmatpush3.bf16.msra.mxu0 %v375_v9  ;;  %v343_v29 = vld [vmem:[#allocation2] ss:$0 sm:$0xff] }
  0x2f   :  { %377 = vmatprep.subr.bf16.mxu0 %v437_v8 }
  0x32   :  { %379 = vmatpush3.bf16.msra.mxu0 %v378_v12 }
  0xfd   :  { %v136_v13 = vpop.f32.mrb[0].mxu1 }
  0xfe   :  { %v357_v14 = vpop.f32.mrb[1].mxu1 }
 0x101   :  { %v210_v15 = vpop.f32.mrb[2].mxu1 }
 0x102   :  { %v211_v17 = vadd.f32 %v210_v15, %v136_v13  ;;  %v362_v18 = vpop.f32.mrb[3].mxu1 }
 0x104   :  { %v221_v19 = vadd.f32 %v339_v16, %v211_v17 }
 0x106   :  { %v222_v20 = vmax.f32 %v221_v19, 0.0 }
 0x108   :  { %372 = vmatmul.mubr.msk.f32.vlgmr.msra.gmra.mrb[0].mxu0 %vm234_vm4, %v222_v20 }
 0x1db   :  { %v304_v22 = vpop.f32.mrb[0].mxu0 }
 0x1dc   :  { %v305_v23 = vadd.f32 %v340_v21, %v304_v22  ;;  %v373_v24 = vpop.f32.mrb[1].mxu0 }
 0x1de   :  { %v308_v26 = vmax.f32 %v305_v23, 0.0 }
 0x1e0   :  { %v316_v27 = vmul.f32 %v342_v25, %v308_v26 }
 0x1e2   :  { %v317_v28 = vsel %vm234_vm4, %v316_v27, 0.0 }
 0x1e3   :  { %318 = vadd.xlane.f32.xlu0 %v317_v28 }
 0x270   :  { %v319_v30 = vpop.xlane.xlu0 %318 }
 0x271   :  { %v327_v31 = vadd.f32 %v343_v29, %v319_v30 }
 0x273   :  { %329 = vst.msk [vmem:[%s554_s9] sm:$0xff] %vm328_vm5, %v327_v31 }
 0x274   :  { %334 = vsyncpa [#allocation4], 1 }
 0x275   :  { %335 = vsyncpa [#allocation6], 1 }

</bundles_post_ra>
